<compile_context>
chip_gen: v7x
topology: tpu7x:2x2x1
jax: 0.10.0
libtpu: 0.0.40
codegen_flags: <defaults>
</compile_context>

<pallas_src>
import functools

import jax
import jax.numpy as jnp
from jax.experimental import pallas as pl
from jax.experimental.pallas import tpu as pltpu


def _mha_kernel(x_ref, wq_ref, wk_ref, wv_ref, wp_ref, bp_ref, o_ref, *,
                causal, num_heads, head_size, block_b, seq_len, out_flat):
    H, hs = num_heads, head_size
    T = seq_len
    C = H * hs
    rows = block_b * T
    cdt = x_ref.dtype                      # bf16 matmul operands

    x = x_ref[...]                         # (rows, C) — pre-flattened rows, no reshape

    # Fused lane-dense projections: one wide MXU matmul each, f32 accumulation.
    # The attention scale is already folded into Wq by the wrapper.
    q = jnp.dot(x, wq_ref[...], preferred_element_type=jnp.float32).astype(cdt)
    k = jnp.dot(x, wk_ref[...], preferred_element_type=jnp.float32).astype(cdt)
    v = jnp.dot(x, wv_ref[...], preferred_element_type=jnp.float32).astype(cdt)

    # One relayout per tensor into a head-major batch layout:
    #   (rows, H*hs) -> (H, rows, hs) -> (H*block_b, T, hs)   [g = h*block_b + b]
    def to_heads(t):
        t = jnp.stack([t[:, h * hs:(h + 1) * hs] for h in range(H)], axis=0)
        return t.reshape(H * block_b, T, hs)

    qh = to_heads(q)
    kh = to_heads(k)
    vh = to_heads(v)

    # Scores for ALL heads & batch rows in one batched einsum (contracts hs,
    # no explicit k.T / XLU transpose).
    s = jnp.einsum('gtd,gsd->gts', qh, kh,
                   preferred_element_type=jnp.float32)          # (G, T, T) f32

    if causal:
        # Hoisted additive large-negative bias (strict causal: diagonal unmasked).
        row = jax.lax.broadcasted_iota(jnp.int32, (T, T), 0)
        col = jax.lax.broadcasted_iota(jnp.int32, (T, T), 1)
        s = s + jnp.where(col <= row, 0.0, -1e30).astype(jnp.float32)

    # Single softmax over all heads, in f32; divide via approximate EUP reciprocal.
    s = s - jnp.max(s, axis=-1, keepdims=True)
    p = jnp.exp(s)
    p = p * pl.reciprocal(jnp.sum(p, axis=-1, keepdims=True), approx=True)

    # Weighted values for all heads at once.
    o = jnp.einsum('gts,gsd->gtd', p.astype(cdt), vh,
                   preferred_element_type=jnp.float32)          # (G, T, hs)

    # Heads back to lanes ("concat") and ONE full-depth (K=C) output projection.
    o = o.astype(cdt).reshape(H, rows, hs)
    o_cat = jnp.concatenate([o[h] for h in range(H)], axis=-1)  # (rows, C)
    out = jnp.dot(o_cat, wp_ref[...],
                  preferred_element_type=jnp.float32) + bp_ref[...]

    if out_flat:
        # Lane-dense output slab: last dim T*C (multiple of 128) -> unmasked stores.
        o_ref[...] = out.reshape(block_b, T * C).astype(o_ref.dtype)
    else:
        o_ref[...] = out.astype(o_ref.dtype)


def _pick_block_b(B, T):
    """Aim for a few hundred rows per grid step, keep >= 2 grid steps (v7x: 2 TCs)."""
    target_rows = 512
    bb = max(1, min(B, target_rows // max(T, 1)))
    while B % bb:
        bb -= 1
    if B // bb < 2 <= B:          # keep both v7x TensorCores busy when possible
        bb = max(1, B // 2)
        while B % bb:
            bb -= 1
    return bb


def _default_vmem_limit():
    # Re-derived per generation: v5e/v6e have 128 MiB physical VMEM, v7x only 64 MiB.
    # Leave headroom so double-buffering never spills the physical budget.
    try:
        cap = pltpu.get_tpu_info().vmem_capacity_bytes
    except Exception:
        cap = 64 * 1024 * 1024
    return int(max(32 * 1024 * 1024, min(cap - cap // 8, 100 * 1024 * 1024)))


def multi_head_attention(x, wq, wk, wv, wp_t, bp, *, mask=False, block_b=None,
                         compute_dtype=jnp.bfloat16, vmem_limit_bytes=None):
    """x: (B, T, C); wq/wk/wv: (H, C, hs) per-head weights (already transposed so
    q_h = x @ wq[h]); wp_t: (C, C) = proj.weight.T; bp: (1, C) or (C,).

    Forward semantics match the PyTorch module (scale = C**-0.5, eval-mode dropout).
    Numerical notes: bf16 MXU operands + approximate softmax reciprocal give
    ~1e-2-level error vs. a pure-f32 reference; softmax rows don't sum exactly to 1.
    """
    B, T, C = x.shape
    H, C2, hs = wq.shape
    assert C2 == C and H * hs == C
    scale = float(C) ** -0.5               # torch module uses C = n_embd for the scale

    if block_b is None:
        block_b = _pick_block_b(B, T)
    assert B % block_b == 0
    rows = block_b * T

    if vmem_limit_bytes is None:
        vmem_limit_bytes = _default_vmem_limit()

    # Pack per-head (H, C, hs) weights into lane-dense (C, H*hs); fold the attention
    # scale into Wq (wrapper-side layout plumbing on tiny constants, folds under jit).
    def pack(w, s=1.0):
        return (jnp.transpose(w, (1, 0, 2)).reshape(C, H * hs) * s).astype(compute_dtype)

    wq_p = pack(wq, scale)
    wk_p = pack(wk)
    wv_p = pack(wv)
    wp_p = wp_t.astype(compute_dtype)
    bp_f32 = jnp.asarray(bp, jnp.float32).reshape(1, C)

    # Pre-flatten x to (B*T, C): row blocks, no in-kernel (Bb,T,C)->(Bb*T,C) relayout.
    x_c = x.reshape(B * T, C).astype(compute_dtype)

    # Lane-dense output path when C < 128 lanes but a (block_b, T*C) block is legal.
    out_flat = (C % 128 != 0) and ((T * C) % 128 == 0) and \
               (block_b % 8 == 0 or block_b == B)
    if out_flat:
        out_shape = jax.ShapeDtypeStruct((B, T * C), x.dtype)
        out_spec = pl.BlockSpec((block_b, T * C), lambda b: (b, 0))
    else:
        out_shape = jax.ShapeDtypeStruct((B * T, C), x.dtype)
        out_spec = pl.BlockSpec((rows, C), lambda b: (b, 0))

    # Grid-invariant weights: single-buffer when large (saves VMEM on v7x's 64 MiB).
    def wspec(shape):
        if C >= 512:
            return pl.BlockSpec(shape, lambda b: (0,) * len(shape),
                                pipeline_mode=pl.Buffered(1))
        return pl.BlockSpec(shape, lambda b: (0,) * len(shape))

    kernel = functools.partial(_mha_kernel, causal=mask, num_heads=H, head_size=hs,
                               block_b=block_b, seq_len=T, out_flat=out_flat)

    out = pl.pallas_call(
        kernel,
        out_shape=out_shape,
        grid_spec=pltpu.PrefetchScalarGridSpec(
            num_scalar_prefetch=0,
            grid=(B // block_b,),
            in_specs=[
                pl.BlockSpec((rows, C), lambda b: (b, 0)),   # x rows (pre-flattened)
                wspec((C, C)),                               # Wq packed (scale folded in)
                wspec((C, C)),                               # Wk packed
                wspec((C, C)),                               # Wv packed
                wspec((C, C)),                               # Wproj^T
                wspec((1, C)),                               # bproj (f32)
            ],
            out_specs=out_spec,
        ),
        compiler_params=pltpu.CompilerParams(
            dimension_semantics=("parallel",),
            vmem_limit_bytes=vmem_limit_bytes),
    )(x_c, wq_p, wk_p, wv_p, wp_p, bp_f32)

    return out.reshape(B, T, C)


def _reference(x, wq, wk, wv, wp_t, bp, *, mask=False):
    """Pure-f32 JAX reference matching the PyTorch module exactly."""
    B, T, C = x.shape
    H = wq.shape[0]
    scale = float(C) ** -0.5
    outs = []
    for h in range(H):
        q = x @ wq[h]
        k = x @ wk[h]
        v = x @ wv[h]
        wei = jnp.einsum("btd,bsd->bts", q, k) * scale
        if mask:
            tri = jnp.tril(jnp.ones((T, T), dtype=bool))
            wei = jnp.where(tri[None], wei, -jnp.inf)
        wei = jax.nn.softmax(wei, axis=-1)
        outs.append(wei @ v)
    cat = jnp.concatenate(outs, axis=-1)
    return cat @ wp_t + bp


if __name__ == "__main__":
    # module hyperparameters (small, consistent with the forward pass)
    n_embd = 32
    num_heads = 4
    head_size = n_embd // num_heads
    T = 8

    key = jax.random.PRNGKey(0)
    kx, kq, kk, kv, kp, kb = jax.random.split(key, 6)

    # nn.Linear(n_embd, head_size, bias=False) per head (transposed), stacked: (H, C, hs)
    wq = jax.random.normal(kq, (num_heads, n_embd, head_size), dtype=jnp.float32) * 0.1
    wk = jax.random.normal(kk, (num_heads, n_embd, head_size), dtype=jnp.float32) * 0.1
    wv = jax.random.normal(kv, (num_heads, n_embd, head_size), dtype=jnp.float32) * 0.1
    # nn.Linear(n_embd, n_embd): stored transposed so the kernel does cat @ Wp + b
    wp_t = jax.random.normal(kp, (n_embd, n_embd), dtype=jnp.float32) * 0.1
    bp = jax.random.normal(kb, (1, n_embd), dtype=jnp.float32) * 0.1

    x_big = jax.random.normal(kx, (16, T, n_embd), dtype=jnp.float32)
    x_small = x_big[:2]                                   # (2, 8, 32)

    # Config 1: small batch, UnmaskedHead (module default) and MaskedHead variants.
    for use_mask in (False, True):
        out = multi_head_attention(x_small, wq, wk, wv, wp_t, bp, mask=use_mask)
        out = jax.block_until_ready(out)
        ref = _reference(x_small, wq, wk, wv, wp_t, bp, mask=use_mask)
        assert out.shape == x_small.shape
        # bf16 MXU operands + approximate reciprocal vs. a pure-f32 reference.
        assert jnp.allclose(out, ref, atol=3e-2, rtol=3e-2), f"mismatch (mask={use_mask})"

    # Config 2: larger batch -> bigger row block (block_b=8, 64 rows/step, grid=2)
    # and the lane-dense (B, T*C) output path.
    out = multi_head_attention(x_big, wq, wk, wv, wp_t, bp, mask=True)
    out = jax.block_until_ready(out)
    ref = _reference(x_big, wq, wk, wv, wp_t, bp, mask=True)
    assert out.shape == x_big.shape
    assert jnp.allclose(out, ref, atol=3e-2, rtol=3e-2), "mismatch (big batch, masked)"

    print("KERNEL_OK")
</pallas_src>

<mosaic_0001>
module attributes {stable_mosaic.version = 11 : i64} {
  func.func @_mha_kernel(%arg0: i32, %arg1: memref<8x32xbf16, #tpu.memory_space<vmem>>, %arg2: memref<32x32xbf16, #tpu.memory_space<vmem>>, %arg3: memref<32x32xbf16, #tpu.memory_space<vmem>>, %arg4: memref<32x32xbf16, #tpu.memory_space<vmem>>, %arg5: memref<32x32xbf16, #tpu.memory_space<vmem>>, %arg6: memref<1x32xf32, #tpu.memory_space<vmem>>, %arg7: memref<8x32xf32, #tpu.memory_space<vmem>>) attributes {dimension_semantics = [#tpu.dimension_semantics<parallel>], iteration_bounds = array<i64: 2>, scalar_prefetch = 0 : i64, scratch_operands = 0 : i64, tpu.core_type = #tpu.core_type<tc>, window_params = [{transform_indices = @transform_0, window_bounds = array<i64: 8, 32>}, {pipeline_mode = #tpu.pipeline_mode<synchronous>, transform_indices = @transform_1, window_bounds = array<i64: 32, 32>}, {pipeline_mode = #tpu.pipeline_mode<synchronous>, transform_indices = @transform_2, window_bounds = array<i64: 32, 32>}, {pipeline_mode = #tpu.pipeline_mode<synchronous>, transform_indices = @transform_3, window_bounds = array<i64: 32, 32>}, {pipeline_mode = #tpu.pipeline_mode<synchronous>, transform_indices = @transform_4, window_bounds = array<i64: 32, 32>}, {pipeline_mode = #tpu.pipeline_mode<synchronous>, transform_indices = @transform_5, window_bounds = array<i64: 1, 32>}, {transform_indices = @transform_6, window_bounds = array<i64: 8, 32>}]} {
    %c0 = arith.constant 0 : index
    %c0_0 = arith.constant 0 : index
    %0 = vector.load %arg1[%c0, %c0_0] : memref<8x32xbf16, #tpu.memory_space<vmem>>, vector<8x32xbf16>
    %c0_1 = arith.constant 0 : index
    %c0_2 = arith.constant 0 : index
    %1 = vector.load %arg2[%c0_1, %c0_2] : memref<32x32xbf16, #tpu.memory_space<vmem>>, vector<32x32xbf16>
    %cst = arith.constant dense<0.000000e+00> : vector<8x32xf32>
    %2 = tpu.matmul %0, %1, %cst {dimension_numbers = #tpu.dot_dimension_numbers<[1], [0], [0], [1], [0, 0, 1, 1], [], []>} : vector<8x32xbf16>, vector<32x32xbf16>, vector<8x32xf32> -> vector<8x32xf32>
    %3 = arith.truncf %2 : vector<8x32xf32> to vector<8x32xbf16>
    %c0_3 = arith.constant 0 : index
    %c0_4 = arith.constant 0 : index
    %4 = vector.load %arg3[%c0_3, %c0_4] : memref<32x32xbf16, #tpu.memory_space<vmem>>, vector<32x32xbf16>
    %cst_5 = arith.constant dense<0.000000e+00> : vector<8x32xf32>
    %5 = tpu.matmul %0, %4, %cst_5 {dimension_numbers = #tpu.dot_dimension_numbers<[1], [0], [0], [1], [0, 0, 1, 1], [], []>} : vector<8x32xbf16>, vector<32x32xbf16>, vector<8x32xf32> -> vector<8x32xf32>
    %6 = arith.truncf %5 : vector<8x32xf32> to vector<8x32xbf16>
    %c0_6 = arith.constant 0 : index
    %c0_7 = arith.constant 0 : index
    %7 = vector.load %arg4[%c0_6, %c0_7] : memref<32x32xbf16, #tpu.memory_space<vmem>>, vector<32x32xbf16>
    %cst_8 = arith.constant dense<0.000000e+00> : vector<8x32xf32>
    %8 = tpu.matmul %0, %7, %cst_8 {dimension_numbers = #tpu.dot_dimension_numbers<[1], [0], [0], [1], [0, 0, 1, 1], [], []>} : vector<8x32xbf16>, vector<32x32xbf16>, vector<8x32xf32> -> vector<8x32xf32>
    %9 = arith.truncf %8 : vector<8x32xf32> to vector<8x32xbf16>
    %10 = vector.extract_strided_slice %3 {offsets = [0, 0], sizes = [8, 8], strides = [1, 1]} : vector<8x32xbf16> to vector<8x8xbf16>
    %11 = vector.extract_strided_slice %3 {offsets = [0, 8], sizes = [8, 8], strides = [1, 1]} : vector<8x32xbf16> to vector<8x8xbf16>
    %12 = vector.extract_strided_slice %3 {offsets = [0, 16], sizes = [8, 8], strides = [1, 1]} : vector<8x32xbf16> to vector<8x8xbf16>
    %13 = vector.extract_strided_slice %3 {offsets = [0, 24], sizes = [8, 8], strides = [1, 1]} : vector<8x32xbf16> to vector<8x8xbf16>
    %14 = vector.shape_cast %10 : vector<8x8xbf16> to vector<1x8x8xbf16>
    %15 = vector.shape_cast %11 : vector<8x8xbf16> to vector<1x8x8xbf16>
    %16 = vector.shape_cast %12 : vector<8x8xbf16> to vector<1x8x8xbf16>
    %17 = vector.shape_cast %13 : vector<8x8xbf16> to vector<1x8x8xbf16>
    %18 = tpu.concatenate %14, %15, %16, %17 in 0 : vector<1x8x8xbf16>, vector<1x8x8xbf16>, vector<1x8x8xbf16>, vector<1x8x8xbf16> -> vector<4x8x8xbf16>
    %19 = vector.extract_strided_slice %6 {offsets = [0, 0], sizes = [8, 8], strides = [1, 1]} : vector<8x32xbf16> to vector<8x8xbf16>
    %20 = vector.extract_strided_slice %6 {offsets = [0, 8], sizes = [8, 8], strides = [1, 1]} : vector<8x32xbf16> to vector<8x8xbf16>
    %21 = vector.extract_strided_slice %6 {offsets = [0, 16], sizes = [8, 8], strides = [1, 1]} : vector<8x32xbf16> to vector<8x8xbf16>
    %22 = vector.extract_strided_slice %6 {offsets = [0, 24], sizes = [8, 8], strides = [1, 1]} : vector<8x32xbf16> to vector<8x8xbf16>
    %23 = vector.shape_cast %19 : vector<8x8xbf16> to vector<1x8x8xbf16>
    %24 = vector.shape_cast %20 : vector<8x8xbf16> to vector<1x8x8xbf16>
    %25 = vector.shape_cast %21 : vector<8x8xbf16> to vector<1x8x8xbf16>
    %26 = vector.shape_cast %22 : vector<8x8xbf16> to vector<1x8x8xbf16>
    %27 = tpu.concatenate %23, %24, %25, %26 in 0 : vector<1x8x8xbf16>, vector<1x8x8xbf16>, vector<1x8x8xbf16>, vector<1x8x8xbf16> -> vector<4x8x8xbf16>
    %28 = vector.extract_strided_slice %9 {offsets = [0, 0], sizes = [8, 8], strides = [1, 1]} : vector<8x32xbf16> to vector<8x8xbf16>
    %29 = vector.extract_strided_slice %9 {offsets = [0, 8], sizes = [8, 8], strides = [1, 1]} : vector<8x32xbf16> to vector<8x8xbf16>
    %30 = vector.extract_strided_slice %9 {offsets = [0, 16], sizes = [8, 8], strides = [1, 1]} : vector<8x32xbf16> to vector<8x8xbf16>
    %31 = vector.extract_strided_slice %9 {offsets = [0, 24], sizes = [8, 8], strides = [1, 1]} : vector<8x32xbf16> to vector<8x8xbf16>
    %32 = vector.shape_cast %28 : vector<8x8xbf16> to vector<1x8x8xbf16>
    %33 = vector.shape_cast %29 : vector<8x8xbf16> to vector<1x8x8xbf16>
    %34 = vector.shape_cast %30 : vector<8x8xbf16> to vector<1x8x8xbf16>
    %35 = vector.shape_cast %31 : vector<8x8xbf16> to vector<1x8x8xbf16>
    %36 = tpu.concatenate %32, %33, %34, %35 in 0 : vector<1x8x8xbf16>, vector<1x8x8xbf16>, vector<1x8x8xbf16>, vector<1x8x8xbf16> -> vector<4x8x8xbf16>
    "tpu.trace_start"() <{level = 10 : i32, message = "gtd,gsd->gts"}> : () -> ()
    %cst_9 = arith.constant dense<0.000000e+00> : vector<4x8x8xf32>
    %37 = tpu.matmul %18, %27, %cst_9 {dimension_numbers = #tpu.dot_dimension_numbers<[2], [2], [1], [1], [0, 0, 0, 1, 1, 1], [0], [0]>} : vector<4x8x8xbf16>, vector<4x8x8xbf16>, vector<4x8x8xf32> -> vector<4x8x8xf32>
    "tpu.trace_stop"() : () -> ()
    %cst_10 = arith.constant dense<0xFF800000> : vector<4x8xf32>
    %38 = vector.multi_reduction <maximumf>, %37, %cst_10 [2] : vector<4x8x8xf32> to vector<4x8xf32>
    %39 = vector.shape_cast %38 : vector<4x8xf32> to vector<4x8x1xf32>
    %40 = vector.broadcast %39 : vector<4x8x1xf32> to vector<4x8x8xf32>
    %41 = arith.subf %37, %40 : vector<4x8x8xf32>
    %42 = math.exp %41 : vector<4x8x8xf32>
    %cst_11 = arith.constant dense<0.000000e+00> : vector<4x8xf32>
    %43 = vector.multi_reduction <add>, %42, %cst_11 [2] : vector<4x8x8xf32> to vector<4x8xf32>
    %44 = vector.shape_cast %43 : vector<4x8xf32> to vector<4x8x1xf32>
    %45 = tpu.reciprocal %44 {approx = true} : vector<4x8x1xf32> -> vector<4x8x1xf32>
    %46 = vector.broadcast %45 : vector<4x8x1xf32> to vector<4x8x8xf32>
    %47 = arith.mulf %42, %46 : vector<4x8x8xf32>
    %48 = arith.truncf %47 : vector<4x8x8xf32> to vector<4x8x8xbf16>
    "tpu.trace_start"() <{level = 10 : i32, message = "gts,gsd->gtd"}> : () -> ()
    %cst_12 = arith.constant dense<0.000000e+00> : vector<4x8x8xf32>
    %49 = tpu.matmul %48, %36, %cst_12 {dimension_numbers = #tpu.dot_dimension_numbers<[2], [1], [1], [2], [0, 0, 0, 1, 1, 2], [0], [0]>} : vector<4x8x8xbf16>, vector<4x8x8xbf16>, vector<4x8x8xf32> -> vector<4x8x8xf32>
    "tpu.trace_stop"() : () -> ()
    %50 = arith.truncf %49 : vector<4x8x8xf32> to vector<4x8x8xbf16>
    %51 = vector.extract_strided_slice %50 {offsets = [0, 0, 0], sizes = [1, 8, 8], strides = [1, 1, 1]} : vector<4x8x8xbf16> to vector<1x8x8xbf16>
    %52 = vector.shape_cast %51 : vector<1x8x8xbf16> to vector<8x8xbf16>
    %53 = vector.extract_strided_slice %50 {offsets = [1, 0, 0], sizes = [1, 8, 8], strides = [1, 1, 1]} : vector<4x8x8xbf16> to vector<1x8x8xbf16>
    %54 = vector.shape_cast %53 : vector<1x8x8xbf16> to vector<8x8xbf16>
    %55 = vector.extract_strided_slice %50 {offsets = [2, 0, 0], sizes = [1, 8, 8], strides = [1, 1, 1]} : vector<4x8x8xbf16> to vector<1x8x8xbf16>
    %56 = vector.shape_cast %55 : vector<1x8x8xbf16> to vector<8x8xbf16>
    %57 = vector.extract_strided_slice %50 {offsets = [3, 0, 0], sizes = [1, 8, 8], strides = [1, 1, 1]} : vector<4x8x8xbf16> to vector<1x8x8xbf16>
    %58 = vector.shape_cast %57 : vector<1x8x8xbf16> to vector<8x8xbf16>
    %59 = tpu.concatenate %52, %54, %56, %58 in 1 : vector<8x8xbf16>, vector<8x8xbf16>, vector<8x8xbf16>, vector<8x8xbf16> -> vector<8x32xbf16>
    %c0_13 = arith.constant 0 : index
    %c0_14 = arith.constant 0 : index
    %60 = vector.load %arg5[%c0_13, %c0_14] : memref<32x32xbf16, #tpu.memory_space<vmem>>, vector<32x32xbf16>
    %cst_15 = arith.constant dense<0.000000e+00> : vector<8x32xf32>
    %61 = tpu.matmul %59, %60, %cst_15 {dimension_numbers = #tpu.dot_dimension_numbers<[1], [0], [0], [1], [0, 0, 1, 1], [], []>} : vector<8x32xbf16>, vector<32x32xbf16>, vector<8x32xf32> -> vector<8x32xf32>
    %c0_16 = arith.constant 0 : index
    %c0_17 = arith.constant 0 : index
    %62 = vector.load %arg6[%c0_16, %c0_17] : memref<1x32xf32, #tpu.memory_space<vmem>>, vector<1x32xf32>
    %63 = vector.broadcast %62 : vector<1x32xf32> to vector<8x32xf32>
    %64 = arith.addf %61, %63 : vector<8x32xf32>
    %c0_18 = arith.constant 0 : index
    %c0_19 = arith.constant 0 : index
    %65 = vector.load %arg7[%c0_18, %c0_19] : memref<8x32xf32, #tpu.memory_space<vmem>>, vector<8x32xf32>
    tpu.vector_store %arg7[%c0_18, %c0_19], %64 {strides = array<i32>} : memref<8x32xf32, #tpu.memory_space<vmem>>, vector<8x32xf32>,
    return
  }
  func.func @transform_0(%arg0: i32) -> (i32, i32) {
    %c0_i32 = arith.constant 0 : i32
    %c0_i32_0 = arith.constant 0 : i32
    return %arg0, %c0_i32 : i32, i32
  }
  func.func @transform_1(%arg0: i32) -> (i32, i32) {
    %c0_i32 = arith.constant 0 : i32
    %c0_i32_0 = arith.constant 0 : i32
    %c0_i32_1 = arith.constant 0 : i32
    return %c0_i32, %c0_i32_0 : i32, i32
  }
  func.func @transform_2(%arg0: i32) -> (i32, i32) {
    %c0_i32 = arith.constant 0 : i32
    %c0_i32_0 = arith.constant 0 : i32
    %c0_i32_1 = arith.constant 0 : i32
    return %c0_i32, %c0_i32_0 : i32, i32
  }
  func.func @transform_3(%arg0: i32) -> (i32, i32) {
    %c0_i32 = arith.constant 0 : i32
    %c0_i32_0 = arith.constant 0 : i32
    %c0_i32_1 = arith.constant 0 : i32
    return %c0_i32, %c0_i32_0 : i32, i32
  }
  func.func @transform_4(%arg0: i32) -> (i32, i32) {
    %c0_i32 = arith.constant 0 : i32
    %c0_i32_0 = arith.constant 0 : i32
    %c0_i32_1 = arith.constant 0 : i32
    return %c0_i32, %c0_i32_0 : i32, i32
  }
  func.func @transform_5(%arg0: i32) -> (i32, i32) {
    %c0_i32 = arith.constant 0 : i32
    %c0_i32_0 = arith.constant 0 : i32
    %c0_i32_1 = arith.constant 0 : i32
    return %c0_i32, %c0_i32_0 : i32, i32
  }
  func.func @transform_6(%arg0: i32) -> (i32, i32) {
    %c0_i32 = arith.constant 0 : i32
    %c0_i32_0 = arith.constant 0 : i32
    return %arg0, %c0_i32 : i32, i32
  }
}

</mosaic_0001>

<bundles_post_ra>
// kernel: tpu_custom_call.1
= control target key start
LH: loop header
LB: loop body
LE: loop exit
PB: predicated region body
PF: predicated region fallthrough
CT: control target
= control target key end

     0   :  { %11 = vsyncpa [#allocation3], 0  ;;  %s2071_s0 = inlined_call_operand.hbm [shape: bf16[16,32], index: 0, kind: input, shape index: {}]   ;;  %s2072_s1 = inlined_call_operand.hbm [shape: bf16[32,32], index: 1, kind: input, shape index: {}]   ;;  %s2073_s2 = inlined_call_operand.hbm [shape: bf16[32,32], index: 2, kind: input, shape index: {}]   ;;  %s2074_s3 = inlined_call_operand.hbm [shape: bf16[32,32], index: 3, kind: input, shape index: {}]   ;;  %s2075_s4 = inlined_call_operand.hbm [shape: bf16[32,32], index: 4, kind: input, shape index: {}]   ;;  %s2076_s5 = inlined_call_operand.vmem [shape: f32[1,32], index: 5, kind: input, shape index: {}]   ;;  %s2077_s6 = inlined_call_operand.hbm [shape: f32[16,32], index: 6, kind: output, shape index: {}]  }
   0x1   :  { %13 = vsyncpa [#allocation3 + $0x1], 0 }
   0x2   :  { %14 = vsyncpa [#allocation6], 0 }
   0x3   :  { %15 = vsyncpa [#allocation9], 0 }
   0x4   :  { %16 = vsyncpa [#allocation4], 0 }
   0x5   :  { %18 = vsyncpa [#allocation4 + $0x1], 0  ;;  %s1690_s21 = smov 0   ;;  %s1692_s22 = smov 0  }
   0x6   :  { %s1694_s23 = smov 0   ;;  %s1696_s24 = smov 0  }
   0x7 LB: > { %s1639_s25 = smov [#allocation5]   ;;  %s1711_s27 = sadd.s32 4294967295, %s1637_s24   ;;  %s1637_s24 = sphi %s1696_s24, %s2101_s24   ;;  %s1633_s23 = sphi %s1694_s23, %s2100_s23   ;;  %s1629_s22 = sphi %s1692_s22, %s2099_s22   ;;  %s1625_s21 = sphi %s1690_s21, %s2098_s21  }
   0x8   : > { %s198_s26 = sshll.u32 %s1639_s25, 4  ;;  %p1152_p0 = scmp.ge.s32.totalorder %s1637_s24, 1  ;;  %s1716_s26 = int_to_ptr.vmem [resolvable:$true] %s198_s26 }
   0x9   : > { %p2078_p1 = scmp.eq.s32.totalorder %s1711_s27, 0  ;;  %p186_p2 = scmp.lt.s32.totalorder %s1637_s24, 3 }
   0xa   : > { %s1640_s29 = smov [#allocation8]   ;;  %s1641_s8 = smov [#allocation7]  }
   0xb   : > { %p1718_p3 = pnand %p1152_p0, %p186_p2  ;;  %s224_s30 = sshll.u32 %s1640_s29, 4  ;;  %s1731_s30 = int_to_ptr.vmem [resolvable:$true] %s224_s30 }
   0xc   : > { %s211_s9 = sshll.u32 %s1641_s8, 4  ;;  %s1421_s12 = scalar_lea.hbm %s2072_s1, 256  ;;  %s1733_s9 = int_to_ptr.vmem [resolvable:$true] %s211_s9 }
   0xd   : > { %s2081_s28 = scalar_select %p1718_p3, 1, 0 }
   0xe   : > { %p1320_p5 = pneg %p1718_p3  ;;  %p1422_p7 = scmp.ne.s32.totalorder %s2072_s1, %s1421_s12 }
   0xf   : > { %p1428_p11 = scmp.lt.u32.totalorder %s1421_s12, %s2072_s1 }
  0x10   : > { %p1727_p6 = pnand %p1320_p5, %p2078_p1 }
  0x12   : > { %p1743_p8 = pneg %p1727_p6 }
  0x14   : > { %p1424_p9 = pnand %p1743_p8, %p1422_p7 }
  0x16   : > { %p1425_p10 = pneg %p1424_p9 }
  0x18   : > { %p1430_p12 = pnand %p1428_p11, %p1425_p10 }
  0x1a   : > { %1433 = shalt.err (!%p1430_p12)
}
  0x1b   : > { %s1434_s18 = scalar_lea.vmem %s1716_s26, 256  ;;  %p1442_p5 = scmp.lt.s32.totalorder %s1716_s26, %s1716_s26 }
  0x1c   : > { %p1435_p13 = scmp.ne.s32.totalorder %s1716_s26, %s1434_s18  ;;  %p1443_p4 = scmp.lt.s32.totalorder %s1434_s18, %s1434_s18 }
  0x1e   : > { %p1437_p0 = pnand %p1435_p13, %p1743_p8  ;;  %p1444_p7 = por %p1443_p4, %p1442_p5 }
  0x20   : > { %p1438_p2 = pneg %p1437_p0 }
  0x22   : > { %p1445_p9 = pnand %p1444_p7, %p1438_p2 }
  0x24   : > { %1448 = shalt.err (!%p1445_p9)
}
  0x25   : > { %s1642_s19 = smov 64   ;;  %s1643_s20 = smov 4  }
  0x26   : > { %1323 = dma.hbm_to_vmem [thread:$0]  (!%p1727_p6), %s2072_s1, 256, %s1716_s26, [#allocation6], %s1642_s19, %s1642_s19, %s1643_s20  }
  0x27   : > { %s1449_s11 = scalar_lea.hbm %s2074_s3, 256 }
  0x28   : > { %p1450_p4 = scmp.ne.s32.totalorder %s2074_s3, %s1449_s11  ;;  %p1456_p12 = scmp.lt.u32.totalorder %s1449_s11, %s2074_s3 }
  0x2a   : > { %p1452_p10 = pnand %p1450_p4, %p1743_p8 }
  0x2c   : > { %p1453_p11 = pneg %p1452_p10 }
  0x2e   : > { %p1458_p13 = pnand %p1456_p12, %p1453_p11 }
  0x30   : > { %1461 = shalt.err (!%p1458_p13)
}
  0x31   : > { %s1462_s26 = scalar_lea.vmem %s1731_s30, 256  ;;  %p1470_p7 = scmp.lt.s32.totalorder %s1731_s30, %s1731_s30 }
  0x32   : > { %p1463_p0 = scmp.ne.s32.totalorder %s1731_s30, %s1462_s26  ;;  %p1471_p9 = scmp.lt.s32.totalorder %s1462_s26, %s1462_s26 }
  0x34   : > { %p1465_p2 = pnand %p1463_p0, %p1743_p8  ;;  %p1472_p4 = por %p1471_p9, %p1470_p7 }
  0x36   : > { %p1466_p5 = pneg %p1465_p2 }
  0x38   : > { %p1473_p10 = pnand %p1472_p4, %p1466_p5 }
  0x3a   : > { %1476 = shalt.err (!%p1473_p10)
}
  0x3b   : > { %1329 = dma.hbm_to_vmem [thread:$0]  (!%p1727_p6), %s2074_s3, 256, %s1731_s30, [#allocation9], %s1642_s19, %s1642_s19, %s1643_s20  }
  0x3c   : > { %s1477_s8 = scalar_lea.hbm %s2073_s2, 256 }
  0x3d   : > { %p1478_p11 = scmp.ne.s32.totalorder %s2073_s2, %s1477_s8  ;;  %p1484_p0 = scmp.lt.u32.totalorder %s1477_s8, %s2073_s2 }
  0x3f   : > { %p1480_p12 = pnand %p1478_p11, %p1743_p8 }
  0x41   : > { %p1481_p13 = pneg %p1480_p12 }
  0x43   : > { %p1486_p2 = pnand %p1484_p0, %p1481_p13 }
  0x45   : > { %1489 = shalt.err (!%p1486_p2)
}
  0x46   : > { %s1490_s30 = scalar_lea.vmem %s1733_s9, 256  ;;  %p1498_p4 = scmp.lt.s32.totalorder %s1733_s9, %s1733_s9 }
  0x47   : > { %p1491_p5 = scmp.ne.s32.totalorder %s1733_s9, %s1490_s30  ;;  %p1499_p10 = scmp.lt.s32.totalorder %s1490_s30, %s1490_s30 }
  0x49   : > { %p1493_p7 = pnand %p1491_p5, %p1743_p8  ;;  %p1500_p11 = por %p1499_p10, %p1498_p4 }
  0x4b   : > { %p1494_p9 = pneg %p1493_p7 }
  0x4d   : > { %p1501_p12 = pnand %p1500_p11, %p1494_p9 }
  0x4f   : > { %1504 = shalt.err (!%p1501_p12)
}
  0x50   : > { %1326 = dma.hbm_to_vmem [thread:$0]  (!%p1727_p6), %s2073_s2, 256, %s1733_s9, [#allocation6], %s1642_s19, %s1642_s19, %s1643_s20  }
  0x51   : > { %s1644_s26 = smov [#allocation10]   ;;  %s1505_s29 = scalar_lea.hbm %s2075_s4, 256 }
  0x52   : > { %s237_s17 = sshll.u32 %s1644_s26, 4  ;;  %p1506_p13 = scmp.ne.s32.totalorder %s2075_s4, %s1505_s29  ;;  %s238_s17 = int_to_ptr.vmem [resolvable:$true] %s237_s17 }
  0x53   : > { %p1512_p5 = scmp.lt.u32.totalorder %s1505_s29, %s2075_s4 }
  0x54   : > { %p1508_p0 = pnand %p1506_p13, %p1743_p8 }
  0x56   : > { %p1509_p2 = pneg %p1508_p0 }
  0x58   : > { %p1514_p7 = pnand %p1512_p5, %p1509_p2 }
  0x5a   : > { %1517 = shalt.err (!%p1514_p7)
}
  0x5b   : > { %s1518_s9 = scalar_lea.vmem %s238_s17, 256  ;;  %p1526_p11 = scmp.lt.s32.totalorder %s238_s17, %s238_s17 }
  0x5c   : > { %p1519_p9 = scmp.ne.s32.totalorder %s238_s17, %s1518_s9  ;;  %p1527_p12 = scmp.lt.s32.totalorder %s1518_s9, %s1518_s9 }
  0x5e   : > { %p1521_p4 = pnand %p1519_p9, %p1743_p8  ;;  %p1528_p1 = por %p1527_p12, %p1526_p11 }
  0x60   : > { %p1522_p10 = pneg %p1521_p4 }
  0x62   : > { %p1529_p3 = pnand %p1528_p1, %p1522_p10 }
  0x64   : > { %1532 = shalt.err (!%p1529_p3)
}
  0x65   : > { %1332 = dma.hbm_to_vmem [thread:$0]  (!%p1727_p6), %s2075_s4, 256, %s238_s17, [#allocation9], %s1642_s19, %s1642_s19, %s1643_s20  }
  0x66   : > { %s1151_s7 = sadd.s32 4294967294, %s1637_s24   ;;  %s1842_s15 = sadd.s32 1, %s1637_s24  }
  0x67   : > { %s28_s14 = ssub.s32 %s1637_s24, %s1842_s15  ;;  %s31_s16 = sadd.s32 1, %s1633_s23 }
  0x68   : > { %p29_p1 = scmp.eq.s32.totalorder %s28_s14, 0  ;;  %p38_p3 = scmp.ne.s32.totalorder %s1633_s23, %s1629_s22 }
  0x69   : > { %p39_p8 = scmp.eq.s32.totalorder %s1637_s24, 0  ;;  %p44_p13 = scmp.ne.s32.totalorder %s1629_s22, %s1625_s21 }
  0x6a   : > { %s1853_s26 = scalar_select %p29_p1, %s1633_s23, %s31_s16  }
  0x6b   : > { %p1855_p0 = por %p39_p8, %p38_p3  ;;  %p2085_p2 = scmp.eq.s32.totalorder %s1711_s27, 0 }
  0x6c   : > { %p173_p5 = scmp.eq.s32.totalorder %s1711_s27, 1  ;;  %p179_p7 = scmp.eq.s32.totalorder %s1151_s7, 1 }
  0x6d   : > { %p1861_p6 = por %p2085_p2, %p44_p13  ;;  %p1345_p9 = scmp.lt.s32.totalorder %s1637_s24, 2 }
  0x6e   : > { %s254_s20 = sand.u32 1, %s1633_s23   ;;  %p1868_p4 = por %p173_p5, %p38_p3 }
  0x6f   : > { %p1872_p10 = por %p179_p7, %p44_p13  ;;  %s1158_s29 = sshll.u32 %s254_s20, 2 }
  0x70   : > { %s2087_s17 = scalar_select %p1868_p4, 1, 0 }
  0x71   : > { %s2088_s25 = scalar_select %p1872_p10, 1, 0 }
  0x72   : > { %s1159_s8 = sshll.u32 %s1637_s24, 6  ;;  %s258_s9 = scalar_lea.vmem [#allocation2], %s1158_s29 }
  0x73   : > { %s1880_s12 = scalar_lea.hbm %s2071_s0, %s1159_s8  ;;  %s265_s13 = sshll.u32 %s258_s9, 4  ;;  %s1882_s13 = int_to_ptr.vmem [resolvable:$true] %s265_s13 }
  0x74   : > { %p1886_p11 = pnand %p1345_p9, %p1855_p0  ;;  %s255_s7 = scalar_lea.sflag [#allocation3], %s254_s20 }
  0x75   : > { %s1533_s14 = scalar_lea.hbm %s1880_s12, 64  ;;  %s1538_s8 = scalar_lea.hbm %s2071_s0, 128 }
  0x76   : > { %p1534_p12 = scmp.ne.s32.totalorder %s1880_s12, %s1533_s14  ;;  %p1535_p1 = pneg %p1886_p11 }
  0x77   : > { %p1539_p13 = scmp.lt.u32.totalorder %s1880_s12, %s2071_s0  ;;  %p1540_p0 = scmp.lt.u32.totalorder %s1538_s8, %s1533_s14 }
  0x78   : > { %p1536_p3 = pnand %p1535_p1, %p1534_p12  ;;  %p1542_p5 = scmp.lt.u32.totalorder %s1533_s14, %s1880_s12 }
  0x79   : > { %p1541_p2 = por %p1540_p0, %p1539_p13 }
  0x7a   : > { %p1537_p8 = pneg %p1536_p3 }
  0x7b   : > { %p1543_p7 = por %p1542_p5, %p1541_p2 }
  0x7d   : > { %p1544_p9 = pnand %p1543_p7, %p1537_p8 }
  0x7f   : > { %1547 = shalt.err (!%p1544_p9)
}
  0x80   : > { %s1548_s20 = scalar_lea.vmem %s1882_s13, 64  ;;  %s1645_s11 = smov [#allocation2]  }
  0x81   : > { %p1549_p12 = scmp.ne.s32.totalorder %s1882_s13, %s1548_s20  ;;  %s1553_s9 = sshll.u32 %s1645_s11, 4  ;;  %s1554_s9 = int_to_ptr.vmem [resolvable:$false] %s1553_s9 }
  0x82   : > { %s1555_s16 = scalar_lea.vmem %s1554_s9, 128  ;;  %p1556_p4 = scmp.lt.s32.totalorder %s1882_s13, %s1554_s9 }
  0x83   : > { %p1551_p3 = pnand %p1549_p12, %p1535_p1  ;;  %p1557_p13 = scmp.lt.s32.totalorder %s1555_s16, %s1548_s20 }
  0x85   : > { %p1552_p10 = pneg %p1551_p3  ;;  %p1558_p0 = por %p1557_p13, %p1556_p4 }
  0x87   : > { %p1559_p2 = pnand %p1558_p0, %p1552_p10 }
  0x89   : > { %1562 = shalt.err (!%p1559_p2)
}
  0x8a   : > { %1336 = dma.hbm_to_vmem [thread:$0]  (!%p1886_p11), %s1880_s12, 64, %s1882_s13, %s255_s7  }
  0x8b   : > { %p2090_p8 = scmp.ne.s32.totalorder %s2081_s28, 0 }
  0x8c   : > { %s1918_s14 = sand.u32 (!%p2090_p8), 1, %s1629_s22  }
  0x8d   : > { %274 = sbr.rel (%p2090_p8) target bundleno = 1596 (0x63c), region = 44  ;;  %s1161_s29 = sshll.u32 (!%p2090_p8), %s1918_s14, 2 }
  0x8e   : > { %s277_s8 = scalar_lea.sflag (!%p2090_p8), [#allocation3], %s1918_s14  ;;  %s280_s18 = scalar_lea.vmem (!%p2090_p8), [#allocation2], %s1161_s29 }
  0x94   : > { %1608 = dma.done.wait (%p1861_p6), %s277_s8, 64  }
  0x95   : > { %1610 = vsyncadd (%p1861_p6), %s277_s8, 4294967232  ;;  %p2091_p4 = scmp.eq.s32.totalorder %s1711_s27, 0 }
  0x97   : > { %1612 = dma.done.wait (%p2091_p4), [#allocation6], 512   ;;  %p2092_p10 = pmov %p2091_p4 }
  0x98   : > { %p2093_p11 = pmov %p2091_p4 }
  0x99   : > { %1614 = vsyncadd (%p2092_p10), [#allocation6], 4294966784 }
  0x9a   : > { %1616 = dma.done.wait (%p2093_p11), [#allocation9], 512   ;;  %p2094_p1 = pmov %p2091_p4 }
  0x9b   : > { %v1646_v0 = vmov 0.0   ;;  %vm1647_vm0 = vmmov 0   ;;  %v1397_v1 = vld [vmem:[#allocation5] sm:$0xff]   ;;  %v1398_v2 = vld [vmem:[#allocation7] sm:$0xff]   ;;  %v1399_v3 = vld [vmem:[#allocation5 + $0x8] sm:$0xff]   ;;  %vm343_vm1 = vcmask 261120  }
  0x9c   : > { %1618 = vsyncadd (%p2094_p1), [#allocation9], 4294966784  ;;  %1220 = vmatprep.subr.bf16.mxu0 %v1646_v0  ;;  %1228 = vmatprep.subr.bf16.mxu1 %v1646_v0  ;;  %v1400_v4 = vld [vmem:[#allocation7 + $0x8] sm:$0xff]   ;;  %v1401_v6 = vld [vmem:[#allocation8] sm:$0xff]   ;;  %vm523_vm2 = vcmask 64512   ;;  %s1648_s28 = smov 120  }
  0x9d   : > { %1224 = vmatprep.mubr.msk.bf16.mxu0 %vm1647_vm0, %v1646_v0  ;;  %1232 = vmatprep.mubr.msk.bf16.mxu1 %vm1647_vm0, %v1646_v0  ;;  %v326_v5 = vld [vmem:[%s280_s18] sm:$0xf]  ;;  %v1402_v7 = vld [vmem:[#allocation8 + $0x8] sm:$0xff]   ;;  %s1649_s19 = smov 104   ;;  %s1650_s12 = smov 112   ;;  %vm759_vm3 = vcmask 1043456  }
  0x9e   : > { %1221 = vmatpush3.bf16.msra.mxu0 %v1397_v1  ;;  %1229 = vmatpush3.bf16.msra.mxu1 %v1398_v2  ;;  %s1651_s13 = smov 8   ;;  %s1652_s30 = smov 16   ;;  %vm957_vm4 = vcmask 130048   ;;  %vm960_vm5 = vcmask 195584  }
  0x9f   : > { %1222 = vmatprep.subr.bf16.mxu0 %v1646_v0  ;;  %1230 = vmatprep.subr.bf16.mxu1 %v1646_v0  ;;  %s1653_s7 = smov 24   ;;  %s1166_s10 = sshll.u32 %s1918_s14, 3 }
  0xa0   : > { %s1189_s9 = sshll.u32 %s1711_s27, 7  ;;  %s324_s16 = scalar_lea.vmem [#allocation11], %s1166_s10 }
  0xa1   : > { %s1043_s29 = sshll.u32 %s324_s16, 4  ;;  %s1030_s27 = scalar_lea.sflag [#allocation4], %s1918_s14  ;;  %s2028_s29 = int_to_ptr.vmem [resolvable:$true] %s1043_s29 }
  0xa2   : > { %1223 = vmatpush3.bf16.msra.mxu0 %v1399_v3  ;;  %1231 = vmatpush3.bf16.msra.mxu1 %v1400_v4  ;;  %p2095_p5 = scmp.ne.s32.totalorder %s2087_s17, 0 }
  0xa3   : > { %1236 = vmatprep.subr.bf16.mxu0 %v1646_v0  ;;  %1244 = vmatprep.subr.bf16.mxu1 %v1646_v0 }
  0xa5   : > { %1225 = vmatmul.mubr.msk.bf16.vlgmr.msra.gmra.mrb[0].mxu0 %vm343_vm1, %v326_v5  ;;  %1233 = vmatmul.mubr.msk.bf16.vlgmr.msra.gmra.mrb[0].mxu1 %vm343_vm1, %v326_v5 }
  0xa6   : > { %1240 = vmatprep.mubr.msk.bf16.mxu0 %vm1647_vm0, %v1646_v0  ;;  %1246 = vmatprep.mubr.msk.bf16.mxu1 %vm1647_vm0, %v1646_v0 }
  0xa7   : > { %1237 = vmatpush3.bf16.msra.mxu0 %v1401_v6 }
  0xa8   : > { %1238 = vmatprep.subr.bf16.mxu0 %v1646_v0 }
  0xab   : > { %1239 = vmatpush3.bf16.msra.mxu0 %v1402_v7 }
  0xac   : > { %1250 = vmatprep.subr.bf16.mxu0 %v1646_v0 }
  0xae   : > { %1241 = vmatmul.mubr.msk.bf16.vlgmr.msra.gmra.mrb[4].mxu0 %vm343_vm1, %v326_v5 }
  0xaf   : > { %1252 = vmatprep.mubr.msk.bf16.mxu0 %vm1647_vm0, %v1646_v0 }
 0x178   : > { %v381_v8 = vpop.f32.mrb[0].mxu0  ;;  %v438_v10 = vpop.f32.mrb[0].mxu1 }
 0x179   : > { %v387_v9 = vpack.c.bf16 %v381_v8, %v381_v8  ;;  %v1226_v11 = vpop.f32.mrb[1].mxu0  ;;  %v444_v12 = vpack.c.bf16 %v438_v10, %v438_v10  ;;  %v1234_v13 = vpop.f32.mrb[1].mxu1 }
 0x17a   : > { %v384_v14 = vpop.f32.mrb[2].mxu0  ;;  %v441_v15 = vpop.f32.mrb[2].mxu1 }
 0x17b   : > { %503 = vrot.lane.b32.xlu1 %v387_v9, %s1648_s28  ;;  %v1227_v16 = vpop.f32.mrb[3].mxu0  ;;  %510 = vrot.lane.b32.xlu0 %v444_v12, %s1648_s28  ;;  %v1235_v17 = vpop.f32.mrb[3].mxu1  ;;  %v528_v18 = vsel %vm523_vm2, %v444_v12, 0 }
 0x17c   : > { %1245 = vmatpush3.bf16.xpose.msra.mxu1 %v528_v18 }
 0x17d   : > { %1256 = vmatprep.subr.bf16.mxu1 %v1646_v0 }
 0x17f   : > { %514 = vrot.lane.b32.xlu1 %v444_v12, %s1649_s19  ;;  %512 = vrot.lane.b32.xlu0 %v444_v12, %s1650_s12 }
 0x181   : > { %v495_v19 = vpop.f32.mrb[4].mxu0 }
 0x182   : > { %v1242_v20 = vpop.f32.mrb[5].mxu0  ;;  %v1969_v29 = vpack.c.bf16 %v495_v19, %v495_v19 }
 0x183   : > { %507 = vrot.lane.b32.xlu1 %v387_v9, %s1649_s19  ;;  %505 = vrot.lane.b32.xlu0 %v387_v9, %s1650_s12  ;;  %v498_v21 = vpop.f32.mrb[6].mxu0 }
 0x184   : > { %1247 = vmatmul.mubr.msk.bf16.vlgmr.msra.gmra.mrb[4].mxu1 %vm523_vm2, %v387_v9  ;;  %v1243_v22 = vpop.f32.mrb[7].mxu0  ;;  %v761_v31 = vsel %vm759_vm3, %v1969_v29, 0 }
 0x185   : > { %1258 = vmatprep.mubr.msk.bf16.mxu1 %vm1647_vm0, %v1646_v0 }
 0x1ed   : > { %v511_v23 = vpop.permute.xlu0 %510  ;;  %v504_v24 = vpop.permute.xlu1 %503 }
 0x1ee   : > { %v574_v25 = vsel %vm523_vm2, %v511_v23, 0 }
 0x1ef   : > { %1251 = vmatpush3.bf16.xpose.msra.mxu0 %v574_v25 }
 0x1f0   : > { %1262 = vmatprep.subr.bf16.mxu0 %v1646_v0 }
 0x1f1   : > { %v513_v26 = vpop.permute.xlu0 %512  ;;  %v515_v28 = vpop.permute.xlu1 %514 }
 0x1f2   : > { %v620_v27 = vsel %vm523_vm2, %v513_v26, 0  ;;  %v666_v30 = vsel %vm523_vm2, %v515_v28, 0 }
 0x1f3   : > { %1257 = vmatpush3.bf16.xpose.msra.mxu1 %v620_v27 }
 0x1f4   : > { %1268 = vmatprep.subr.bf16.mxu1 %v1646_v0 }
 0x1f5   : > { %v506_v32 = vpop.permute.xlu0 %505  ;;  %v508_v33 = vpop.permute.xlu1 %507 }
 0x1f6   : > { %1253 = vmatmul.mubr.msk.bf16.vlgmr.msra.gmra.mrb[8].mxu0 %vm523_vm2, %v504_v24 }
 0x1f7   : > { %1263 = vmatpush3.bf16.xpose.msra.mxu0 %v666_v30  ;;  %1264 = vmatprep.mubr.msk.bf16.mxu0 %vm1647_vm0, %v1646_v0 }
 0x1f8   : > { %1274 = vmatprep.subr.bf16.mxu0 %v1646_v0 }
 0x1fa   : > { %1259 = vmatmul.mubr.msk.bf16.vlgmr.msra.gmra.mrb[8].mxu1 %vm523_vm2, %v506_v32 }
 0x1fb   : > { %1269 = vmatpush3.bf16.msra.mxu1 %v761_v31  ;;  %1270 = vmatprep.mubr.msk.bf16.mxu1 %vm1647_vm0, %v1646_v0 }
 0x1fc   : > { %1280 = vmatprep.subr.bf16.mxu1 %v1646_v0 }
 0x1fe   : > { %1265 = vmatmul.mubr.msk.bf16.vlgmr.msra.gmra.mrb[12].mxu0 %vm523_vm2, %v508_v33 }
 0x1ff   : > { %1276 = vmatprep.mubr.msk.bf16.mxu0 %vm1647_vm0, %v1646_v0 }
 0x257   : > { %v564_v34 = vpop.f32.mrb[4].mxu1 }
 0x258   : > { %v1248_v35 = vpop.f32.mrb[5].mxu1  ;;  %v708_v36 = vsel %vm523_vm2, %v564_v34, -inf }
 0x259   : > { %709 = vmax.xlane.f32.xlu0 %v708_v36  ;;  %v567_v37 = vpop.f32.mrb[6].mxu1 }
 0x25a   : > { %v1249_v38 = vpop.f32.mrb[7].mxu1  ;;  %v1403_v37 = vld [vmem:[#allocation10] sm:$0xff]  }
 0x25b   : > { %v1404_v38 = vld [vmem:[#allocation10 + $0x8] sm:$0xff]  }
 0x2c9   : > { %v610_v39 = vpop.f32.mrb[8].mxu0 }
 0x2ca   : > { %v1254_v40 = vpop.f32.mrb[9].mxu0  ;;  %v711_v41 = vsel %vm523_vm2, %v610_v39, -inf }
 0x2cb   : > { %712 = vmax.xlane.f32.xlu1 %v711_v41  ;;  %v613_v42 = vpop.f32.mrb[10].mxu0 }
 0x2cc   : > { %v1255_v43 = vpop.f32.mrb[11].mxu0 }
 0x2cd   : > { %v656_v44 = vpop.f32.mrb[8].mxu1 }
 0x2ce   : > { %v1260_v45 = vpop.f32.mrb[9].mxu1  ;;  %v714_v46 = vsel %vm523_vm2, %v656_v44, -inf }
 0x2cf   : > { %715 = vmax.xlane.f32.xlu0 %v714_v46  ;;  %v659_v47 = vpop.f32.mrb[10].mxu1 }
 0x2d0   : > { %v1261_v48 = vpop.f32.mrb[11].mxu1 }
 0x2d1   : > { %v702_v49 = vpop.f32.mrb[12].mxu0 }
 0x2d2   : > { %v1266_v50 = vpop.f32.mrb[13].mxu0  ;;  %v717_v51 = vsel %vm523_vm2, %v702_v49, -inf }
 0x2d3   : > { %718 = vmax.xlane.f32.xlu0 %v717_v51  ;;  %v705_v52 = vpop.f32.mrb[14].mxu0 }
 0x2d4   : > { %v1267_v53 = vpop.f32.mrb[15].mxu0 }
 0x2dc   : > { %517 = vrot.lane.b32.xlu1 %v1969_v29, %s1648_s28  ;;  %s2026_s28 = scalar_lea.hbm %s2077_s6, %s1189_s9 }
 0x2e6   : > { %v710_v54 = vpop.xlane.xlu0 %709 }
 0x2e7   : > { %v720_v55 = vsub.f32 %v564_v34, %v710_v54 }
 0x2e9   : > { %v724_v56 = vmul.f32 1.442695, %v720_v55 }
 0x2eb   : > { %1405 = vpow2.f32 %v724_v56 }
 0x2f5   : > { %v1406_v57 = vpop.eup %1405 }
 0x2f6   : > { %v732_v58 = vsel %vm523_vm2, %v1406_v57, 0.0 }
 0x300   : > { %733 = vadd.xlane.f32.xlu1 %v732_v58 }
 0x358   : > { %v713_v59 = vpop.xlane.xlu1 %712 }
 0x359   : > { %v721_v60 = vsub.f32 %v610_v39, %v713_v59 }
 0x35b   : > { %v726_v61 = vmul.f32 1.442695, %v721_v60  ;;  %v1184_v60 = vld [vmem:[%s2076_s5] ss:$0 sm:$0xff] }
 0x35c   : > { %v716_v62 = vpop.xlane.xlu0 %715  ;;  %v518_v63 = vpop.permute.xlu1 %517 }
 0x35d   : > { %1407 = vpow2.f32 %v726_v61  ;;  %v722_v1 = vsub.f32 %v656_v44, %v716_v62  ;;  %v807_v2 = vsel %vm759_vm3, %v518_v63, 0 }
 0x35e   : > { %1275 = vmatpush3.bf16.msra.mxu0 %v807_v2 }
 0x35f   : > { %v728_v3 = vmul.f32 1.442695, %v722_v1  ;;  %1286 = vmatprep.subr.bf16.mxu0 %v1646_v0 }
 0x360   : > { %v719_v4 = vpop.xlane.xlu0 %718 }
 0x361   : > { %1409 = vpow2.f32 %v728_v3  ;;  %v723_v5 = vsub.f32 %v702_v49, %v719_v4 }
 0x363   : > { %v730_v6 = vmul.f32 1.442695, %v723_v5 }
 0x365   : > { %1411 = vpow2.f32 %v730_v6 }
 0x367   : > { %v1408_v7 = vpop.eup %1407 }
 0x368   : > { %v735_v8 = vsel %vm523_vm2, %v1408_v7, 0.0 }
 0x369   : > { %736 = vadd.xlane.f32.xlu0 %v735_v8 }
 0x36b   : > { %v1410_v9 = vpop.eup %1409 }
 0x36c   : > { %v738_v10 = vsel %vm523_vm2, %v1410_v9, 0.0 }
 0x36d   : > { %739 = vadd.xlane.f32.xlu1 %v738_v10 }
 0x36f   : > { %v1412_v11 = vpop.eup %1411 }
 0x370   : > { %v741_v12 = vsel %vm523_vm2, %v1412_v11, 0.0 }
 0x371   : > { %742 = vadd.xlane.f32.xlu0 %v741_v12 }
 0x37e   : > { %521 = vrot.lane.b32.xlu1 %v1969_v29, %s1649_s19  ;;  %s1563_s19 = scalar_lea.vmem %s2028_s29, 128 }
 0x37f   : > { %p1564_p6 = scmp.ne.s32.totalorder %s2028_s29, %s1563_s19 }
 0x381   : > { %p1565_p7 = pnand %p1564_p6, %p2095_p5 }
 0x383   : > { %p1566_p9 = pneg %p1565_p7 }
 0x387   : > { %519 = vrot.lane.b32.xlu0 %v1969_v29, %s1650_s12  ;;  %s1654_s12 = smov [#allocation11]  }
 0x38d   : > { %v734_v13 = vpop.xlane.xlu1 %733 }
 0x38e   : > { %1413 = vrcp.f32 %v734_v13 }
 0x398   : > { %v1414_v14 = vpop.eup %1413 }
 0x399   : > { %v748_v15 = vmul.f32 %v1414_v14, %v1406_v57 }
 0x39b   : > { %v752_v16 = vpack.c.bf16 %v748_v15, %v748_v15 }
 0x39d   : > { %1271 = vmatmul.mubr.msk.bf16.vlgmr.msra.gmra.mrb[12].mxu1 %vm523_vm2, %v752_v16 }
 0x39e   : > { %1282 = vmatprep.mubr.msk.bf16.mxu1 %vm1647_vm0, %v1646_v0 }
 0x3f6   : > { %v737_v17 = vpop.xlane.xlu0 %736 }
 0x3f7   : > { %1415 = vrcp.f32 %v737_v17 }
 0x3fa   : > { %v740_v18 = vpop.xlane.xlu1 %739 }
 0x3fb   : > { %1417 = vrcp.f32 %v740_v18 }
 0x3fe   : > { %v743_v19 = vpop.xlane.xlu0 %742  ;;  %v522_v23 = vpop.permute.xlu1 %521 }
 0x3ff   : > { %1419 = vrcp.f32 %v743_v19  ;;  %v899_v28 = vsel %vm759_vm3, %v522_v23, 0 }
 0x401   : > { %v1416_v20 = vpop.eup %1415 }
 0x402   : > { %v749_v21 = vmul.f32 %v1416_v20, %v1408_v7  ;;  %v520_v22 = vpop.permute.xlu0 %519 }
 0x403   : > { %v853_v24 = vsel %vm759_vm3, %v520_v22, 0 }
 0x404   : > { %1281 = vmatpush3.bf16.msra.mxu1 %v853_v24  ;;  %v753_v25 = vpack.c.bf16 %v749_v21, %v749_v21 }
 0x405   : > { %v1418_v26 = vpop.eup %1417  ;;  %1292 = vmatprep.subr.bf16.mxu1 %v1646_v0 }
 0x406   : > { %v750_v27 = vmul.f32 %v1418_v26, %v1410_v9  ;;  %1277 = vmatmul.mubr.msk.bf16.vlgmr.msra.gmra.mrb[16].mxu0 %vm523_vm2, %v753_v25 }
 0x407   : > { %1287 = vmatpush3.bf16.msra.mxu0 %v899_v28  ;;  %1288 = vmatprep.mubr.msk.bf16.mxu0 %vm1647_vm0, %v1646_v0 }
 0x408   : > { %v754_v29 = vpack.c.bf16 %v750_v27, %v750_v27 }
 0x409   : > { %v1420_v30 = vpop.eup %1419 }
 0x40a   : > { %v751_v31 = vmul.f32 %v1420_v30, %v1412_v11  ;;  %1283 = vmatmul.mubr.msk.bf16.vlgmr.msra.gmra.mrb[16].mxu1 %vm523_vm2, %v754_v29 }
 0x40b   : > { %1296 = vmatprep.mubr.msk.bf16.mxu1 %vm1647_vm0, %v1646_v0  ;;  %1293 = vmatpush3.bf16.msra.mxu1 %v1403_v37 }
 0x40c   : > { %v755_v32 = vpack.c.bf16 %v751_v31, %v751_v31  ;;  %1294 = vmatprep.subr.bf16.mxu1 %v1646_v0 }
 0x40e   : > { %1289 = vmatmul.mubr.msk.bf16.vlgmr.msra.gmra.mrb[20].mxu0 %vm523_vm2, %v755_v32 }
 0x40f   : > { %1295 = vmatpush3.bf16.msra.mxu1 %v1404_v38 }
 0x470   : > { %v797_v33 = vpop.f32.mrb[12].mxu1 }
 0x471   : > { %v1272_v34 = vpop.f32.mrb[13].mxu1  ;;  %v941_v54 = vpack.c.bf16 %v797_v33, %v797_v33 }
 0x472   : > { %v800_v35 = vpop.f32.mrb[14].mxu1 }
 0x473   : > { %v1273_v36 = vpop.f32.mrb[15].mxu1 }
 0x4d9   : > { %v843_v39 = vpop.f32.mrb[16].mxu0 }
 0x4da   : > { %v942_v40 = vpack.c.bf16 %v843_v39, %v843_v39  ;;  %v1278_v41 = vpop.f32.mrb[17].mxu0 }
 0x4db   : > { %v846_v42 = vpop.f32.mrb[18].mxu0 }
 0x4dc   : > { %946 = vrot.lane.b32.xlu1 %v942_v40, %s1651_s13  ;;  %v1279_v43 = vpop.f32.mrb[19].mxu0  ;;  %s1567_s13 = sshll.u32 %s1654_s12, 4  ;;  %s1568_s13 = int_to_ptr.vmem [resolvable:$false] %s1567_s13 }
 0x4dd   : > { %v889_v44 = vpop.f32.mrb[16].mxu1  ;;  %p1570_p12 = scmp.lt.s32.totalorder %s2028_s29, %s1568_s13 }
 0x4de   : > { %v943_v45 = vpack.c.bf16 %v889_v44, %v889_v44  ;;  %v1284_v46 = vpop.f32.mrb[17].mxu1 }
 0x4df   : > { %v892_v47 = vpop.f32.mrb[18].mxu1 }
 0x4e0   : > { %949 = vrot.lane.b32.xlu0 %v943_v45, %s1652_s30  ;;  %v1285_v48 = vpop.f32.mrb[19].mxu1  ;;  %s1569_s30 = scalar_lea.vmem %s1568_s13, 256 }
 0x4e1   : > { %v935_v49 = vpop.f32.mrb[20].mxu0  ;;  %p1571_p3 = scmp.lt.s32.totalorder %s1569_s30, %s1563_s19 }
 0x4e2   : > { %v944_v50 = vpack.c.bf16 %v935_v49, %v935_v49  ;;  %v1290_v0 = vpop.f32.mrb[21].mxu0 }
 0x4e3   : > { %v938_v51 = vpop.f32.mrb[22].mxu0  ;;  %p1572_p13 = por %p1571_p3, %p1570_p12 }
 0x4e4   : > { %952 = vrot.lane.b32.xlu1 %v944_v50, %s1653_s7  ;;  %v1291_v52 = vpop.f32.mrb[23].mxu0 }
 0x4e5   : > { %p1573_p0 = pnand %p1572_p13, %p1566_p9 }
 0x54e   : > { %v947_v53 = vpop.permute.xlu1 %946 }
 0x54f   : > { %v956_v56 = vsel %vm523_vm2, %v941_v54, %v947_v53 }
 0x552   : > { %v950_v55 = vpop.permute.xlu0 %949 }
 0x553   : > { %v959_v57 = vsel %vm957_vm4, %v956_v56, %v950_v55 }
 0x556   : > { %v953_v58 = vpop.permute.xlu1 %952 }
 0x557   : > { %v962_v59 = vsel %vm960_vm5, %v959_v57, %v953_v58 }
 0x558   : > { %1297 = vmatmul.mubr.msk.bf16.vlgmr.msra.gmra.mrb[20].mxu1 %vm343_vm1, %v962_v59 }
 0x62b   : > { %v1022_v61 = vpop.f32.mrb[20].mxu1 }
 0x62c   : > { %v1023_v62 = vadd.f32 %v1184_v60, %v1022_v61  ;;  %v1298_v63 = vpop.f32.mrb[21].mxu1 }
 0x62d   : > { %v1025_v1 = vpop.f32.mrb[22].mxu1 }
 0x62e   : > { %v1299_v2 = vpop.f32.mrb[23].mxu1  ;;  %1028 = vst.msk [vmem:[%s324_s16] sm:$0xff] %vm343_vm1, %v1023_v62 }
 0x62f   : > { %1576 = shalt.err (!%p1573_p0)
}
 0x630   : > { %s1577_s14 = scalar_lea.hbm %s2026_s28, 128  ;;  %s1581_s20 = scalar_lea.hbm %s2077_s6, 256 }
 0x631   : > { %p1578_p2 = scmp.ne.s32.totalorder %s2026_s28, %s1577_s14  ;;  %p1582_p10 = scmp.lt.u32.totalorder %s2026_s28, %s2077_s6 }
 0x632   : > { %p1583_p11 = scmp.lt.u32.totalorder %s1581_s20, %s1577_s14  ;;  %p1585_p6 = scmp.lt.u32.totalorder %s1577_s14, %s2026_s28 }
 0x633   : > { %p1579_p8 = pnand %p1578_p2, %p2095_p5 }
 0x634   : > { %p1584_p1 = por %p1583_p11, %p1582_p10 }
 0x635   : > { %p1580_p4 = pneg %p1579_p8 }
 0x636   : > { %p1586_p7 = por %p1585_p6, %p1584_p1 }
 0x638   : > { %p1587_p9 = pnand %p1586_p7, %p1580_p4 }
 0x63a   : > { %1590 = shalt.err (!%p1587_p9)
}
 0x63b   : > { %1318 = dma.vmem_to_hbm [thread:$0]  (%p2095_p5), %s2028_s29, 128, %s2026_s28, %s1030_s27  }
 0x63c PF: > { %s1055_s16 = sand.u32 1, %s1625_s21   ;;  %p2096_p12 = scmp.ne.s32.totalorder %s2088_s25, 0 }
 0x63d   : > { %p2097_p3 = scmp.ge.s32.totalorder %s1637_s24, 2  ;;  %s1056_s8 = scalar_lea.sflag [#allocation4], %s1055_s16 }
 0x63f   : > { %p1338_p13 = pnand %p2097_p3, %p2096_p12 }
 0x641   : > { %1620 = dma.done.wait (!%p1338_p13), %s1056_s8, 128  }
 0x642   : > { %1622 = vsyncadd (!%p1338_p13), %s1056_s8, 4294967168  ;;  %p21_p0 = scmp.ge.s32.totalorder %s1842_s15, 4   ;;  %s2098_s21 = smov %s1629_s22 }
 0x643   : > { %s2099_s22 = smov %s1633_s23  ;;  %s2100_s23 = smov %s1853_s26 }
 0x644   : > { %s2101_s24 = smov %s1842_s15  ;;  %23 = sbr.rel (!%p21_p0) target bundleno = 7 (0x7), region = 105 }
 0x64b   :  { %1061 = vsyncpa [#allocation3], 1 }
 0x64c   :  { %1063 = vsyncpa [#allocation3 + $0x1], 1 }
 0x64d   :  { %1064 = vsyncpa [#allocation6], 1 }
 0x64e   :  { %1065 = vsyncpa [#allocation9], 1 }
 0x64f   :  { %1066 = vsyncpa [#allocation4], 1 }
 0x650   :  { %1068 = vsyncpa [#allocation4 + $0x1], 1 }

</bundles_post_ra>
